<compile_context>
chip_gen: v7x
topology: tpu7x:2x2x1
jax: 0.10.0
libtpu: 0.0.40
codegen_flags: <defaults>
</compile_context>

<pallas_src>
import functools

import jax
import jax.numpy as jnp
from jax import lax
from jax.experimental import pallas as pl
from jax.experimental.pallas import tpu as pltpu


# ---------------------------------------------------------------------------
# Kernel 1: embedding gather (row DMAs from HBM) + max_norm renorm.
# ---------------------------------------------------------------------------
def gather_renorm_kernel(idx_ref, emb_hbm, x_ref, x_scratch, sem, *, max_norm):
    """idx_ref   : SMEM (N,) int32   (scalar prefetch)
       emb_hbm   : HBM  (V, D)       (never copied wholesale into VMEM)
       x_ref     : VMEM (N, D)       output (renormed embeddings)
       x_scratch : VMEM (N, D) scratch; sem: DMA semaphores (N,)
    """
    n = x_ref.shape[0]
    # Issue one row DMA per token id, then wait on all of them.
    # TODO(synk): for large N, switch this static Python unroll to pl.loop with
    # a small ring of semaphores instead of one semaphore per row.
    copies = []
    for i in range(n):
        cp = pltpu.make_async_copy(
            emb_hbm.at[pl.ds(idx_ref[i], 1), :],
            x_scratch.at[pl.ds(i, 1), :],
            sem.at[i])
        cp.start()
        copies.append(cp)
    for cp in copies:
        cp.wait()

    x = x_scratch[...].astype(jnp.float32)
    # nn.Embedding(max_norm=M): rows with L2 norm > M are scaled by M/(norm+1e-7).
    norm = jnp.sqrt(jnp.sum(x * x, axis=-1, keepdims=True))
    scale = jnp.where(norm > max_norm, max_norm / (norm + 1e-7), 1.0)
    x_ref[...] = (x * scale).astype(x_ref.dtype)


def gather_renorm(idx, emb_table, max_norm):
    """idx: (N,) int32 (N a multiple of 8); emb_table: (V, D). Returns (N, D)."""
    n = idx.shape[0]
    v, d = emb_table.shape
    return pl.pallas_call(
        functools.partial(gather_renorm_kernel, max_norm=float(max_norm)),
        out_shape=jax.ShapeDtypeStruct((n, d), emb_table.dtype),
        grid_spec=pltpu.PrefetchScalarGridSpec(
            num_scalar_prefetch=1,                       # idx -> SMEM
            grid=(1,),
            in_specs=[pl.BlockSpec(memory_space=pl.ANY)],  # table stays in HBM
            out_specs=pl.BlockSpec((n, d), lambda i, idx_ref: (0, 0)),
            scratch_shapes=[pltpu.VMEM((n, d), emb_table.dtype),
                            pltpu.SemaphoreType.DMA((n,))],
        ),
    )(idx, emb_table)


# ---------------------------------------------------------------------------
# Kernel 2: weight-streaming linear layer  y = x @ W.T + b  over vocab tiles.
# ---------------------------------------------------------------------------
def linear_kernel(x_ref, w_ref, b_ref, out_ref):
    """x: (N, D); w: (TV, D) natural PyTorch layout; b: (1, TV); out: (N, TV)."""
    y = lax.dot_general(
        x_ref[...], w_ref[...],
        dimension_numbers=(((1,), (1,)), ((), ())),      # contract D vs D: x @ W.T
        preferred_element_type=jnp.float32)
    out_ref[...] = (y + b_ref[...].astype(jnp.float32)).astype(out_ref.dtype)


def linear(x, w, b, *, tv=512):
    """x: (N, D); w: (V, D); b: (V,). Returns (N, V) float32 logits."""
    n, d = x.shape
    v = w.shape[0]
    tv = min(tv, v)
    v_pad = pl.cdiv(v, tv) * tv
    if v_pad != v:                                       # pad vocab so tv | V
        w = jnp.pad(w, ((0, v_pad - v), (0, 0)))
        b = jnp.pad(b, (0, v_pad - v))
    b2 = b.reshape(1, v_pad)

    out = pl.pallas_call(
        linear_kernel,
        out_shape=jax.ShapeDtypeStruct((n, v_pad), jnp.float32),
        grid=(v_pad // tv,),
        in_specs=[
            pl.BlockSpec((n, d), lambda j: (0, 0)),      # x resident across grid
            pl.BlockSpec((tv, d), lambda j: (j, 0)),     # W vocab tile, no transpose
            pl.BlockSpec((1, tv), lambda j: (0, j)),     # bias vocab tile
        ],
        out_specs=pl.BlockSpec((n, tv), lambda j: (0, j)),
        compiler_params=pltpu.CompilerParams(
            dimension_semantics=("parallel",)),          # shards across v7x's 2 TCs
    )(x, w, b2)
    return out[:, :v]


# ---------------------------------------------------------------------------
# Full forward.
# ---------------------------------------------------------------------------
def skipgram_forward(inputs_, emb_table, w, b, max_norm, *, tv=512,
                     stream_dtype=None):
    """inputs_: int [B, S] (or any shape) token ids; emb_table: [V, D];
       w: [V, D] (PyTorch nn.Linear layout); b: [V].
       stream_dtype: optionally bf16 to halve the streamed-W bytes (HBM-bound GEMM);
       default None keeps f32 to match PyTorch numerics exactly."""
    orig_shape = inputs_.shape
    idx = inputs_.reshape(-1).astype(jnp.int32)
    n = idx.shape[0]
    n_pad = pl.cdiv(n, 8) * 8                            # sublane-align the row count
    if n_pad != n:
        idx = jnp.pad(idx, (0, n_pad - n))               # index 0 is a valid row

    x = gather_renorm(idx, emb_table, max_norm)          # (n_pad, D)
    if stream_dtype is not None:
        x = x.astype(stream_dtype)
        w = w.astype(stream_dtype)
    logits = linear(x, w, b, tv=tv)                      # (n_pad, V) f32
    logits = logits[:n]
    return logits.reshape(*orig_shape, w.shape[0])


def ref_forward(inputs_, emb_table, w, b, max_norm):
    """Plain-JAX reference matching PyTorch SkipGram_MODEL.forward."""
    x = emb_table[inputs_]                               # (B, S, D)
    norm = jnp.sqrt(jnp.sum(x * x, axis=-1, keepdims=True))
    scale = jnp.where(norm > max_norm, max_norm / (norm + 1e-7), 1.0)
    x = x * scale
    return x @ w.T + b


if __name__ == "__main__":
    # Small, deterministic config consistent with the module's __init__.
    VOCAB_SIZE = 256
    EMBED_DIMENSION = 128
    EMBED_MAX_NORM = 1.0
    B, S = 2, 4                                          # inputs_: [B, S] token ids

    key = jax.random.PRNGKey(0)
    k_emb, k_w, k_b, k_idx = jax.random.split(key, 4)

    # nn.Embedding default init: N(0, 1); nn.Linear default: U(-1/sqrt(D), 1/sqrt(D)).
    emb_table = jax.random.normal(k_emb, (VOCAB_SIZE, EMBED_DIMENSION), jnp.float32)
    bound = 1.0 / (EMBED_DIMENSION ** 0.5)
    w = jax.random.uniform(k_w, (VOCAB_SIZE, EMBED_DIMENSION), jnp.float32,
                           minval=-bound, maxval=bound)
    b = jax.random.uniform(k_b, (VOCAB_SIZE,), jnp.float32,
                           minval=-bound, maxval=bound)

    inputs_ = jax.random.randint(k_idx, (B, S), 0, VOCAB_SIZE, dtype=jnp.int32)

    out = skipgram_forward(inputs_, emb_table, w, b, EMBED_MAX_NORM)
    out = jax.block_until_ready(out)

    expected = ref_forward(inputs_, emb_table, w, b, EMBED_MAX_NORM)
    assert out.shape == (B, S, VOCAB_SIZE), out.shape
    assert jnp.allclose(out, expected, atol=1e-4, rtol=1e-4), "mismatch vs reference"

    print("KERNEL_OK")
</pallas_src>

<mosaic_0001>
module attributes {stable_mosaic.version = 11 : i64} {
  func.func @gather_renorm_kernel(%arg0: i32, %arg1: memref<8xi32, #tpu.memory_space<smem>>, %arg2: memref<256x128xf32, #tpu.memory_space<any>>, %arg3: memref<8x128xf32, #tpu.memory_space<vmem>>, %arg4: memref<8x128xf32, #tpu.memory_space<vmem>>, %arg5: memref<8x!tpu.dma_semaphore, #tpu.memory_space<semaphore_mem>>) attributes {dimension_semantics = [#tpu.dimension_semantics<arbitrary>], iteration_bounds = array<i64: 1>, scalar_prefetch = 1 : i64, scratch_operands = 2 : i64, tpu.core_type = #tpu.core_type<tc>, window_params = [{}, {pipeline_mode = #tpu.pipeline_mode<synchronous>, transform_indices = @transform_1, window_bounds = array<i64: 8, 128>}]} {
    %c0 = arith.constant 0 : index
    %0 = memref.load %arg1[%c0] : memref<8xi32, #tpu.memory_space<smem>>
    %c0_i32 = arith.constant 0 : i32
    %c0_i32_0 = arith.constant 0 : i32
    %1 = tpu.memref_slice %arg2[%0, %c0_i32_0] : memref<256x128xf32, #tpu.memory_space<any>> -> memref<1x128xf32, #tpu.memory_space<any>>
    %c0_i32_1 = arith.constant 0 : i32
    %c0_i32_2 = arith.constant 0 : i32
    %2 = tpu.memref_slice %arg4[%c0_i32_1, %c0_i32_2] : memref<8x128xf32, #tpu.memory_space<vmem>> -> memref<1x128xf32, #tpu.memory_space<vmem>>
    %3 = tpu.memref_slice %arg5[%c0_i32] : memref<8x!tpu.dma_semaphore, #tpu.memory_space<semaphore_mem>> -> memref<1x!tpu.dma_semaphore, #tpu.memory_space<semaphore_mem>>
    %4 = tpu.memref_squeeze %3 : memref<1x!tpu.dma_semaphore, #tpu.memory_space<semaphore_mem>> -> memref<!tpu.dma_semaphore, #tpu.memory_space<semaphore_mem>>
    tpu.enqueue_dma source(%1 : memref<1x128xf32, #tpu.memory_space<any>>) target(%2 : memref<1x128xf32, #tpu.memory_space<vmem>>) target_semaphore(%4 : memref<!tpu.dma_semaphore, #tpu.memory_space<semaphore_mem>>)
    %c1 = arith.constant 1 : index
    %5 = memref.load %arg1[%c1] : memref<8xi32, #tpu.memory_space<smem>>
    %c1_i32 = arith.constant 1 : i32
    %c0_i32_3 = arith.constant 0 : i32
    %6 = tpu.memref_slice %arg2[%5, %c0_i32_3] : memref<256x128xf32, #tpu.memory_space<any>> -> memref<1x128xf32, #tpu.memory_space<any>>
    %c1_i32_4 = arith.constant 1 : i32
    %c0_i32_5 = arith.constant 0 : i32
    %7 = tpu.memref_slice %arg4[%c1_i32_4, %c0_i32_5] : memref<8x128xf32, #tpu.memory_space<vmem>> -> memref<1x128xf32, #tpu.memory_space<vmem>>
    %8 = tpu.memref_slice %arg5[%c1_i32] : memref<8x!tpu.dma_semaphore, #tpu.memory_space<semaphore_mem>> -> memref<1x!tpu.dma_semaphore, #tpu.memory_space<semaphore_mem>>
    %9 = tpu.memref_squeeze %8 : memref<1x!tpu.dma_semaphore, #tpu.memory_space<semaphore_mem>> -> memref<!tpu.dma_semaphore, #tpu.memory_space<semaphore_mem>>
    tpu.enqueue_dma source(%6 : memref<1x128xf32, #tpu.memory_space<any>>) target(%7 : memref<1x128xf32, #tpu.memory_space<vmem>>) target_semaphore(%9 : memref<!tpu.dma_semaphore, #tpu.memory_space<semaphore_mem>>)
    %c2 = arith.constant 2 : index
    %10 = memref.load %arg1[%c2] : memref<8xi32, #tpu.memory_space<smem>>
    %c2_i32 = arith.constant 2 : i32
    %c0_i32_6 = arith.constant 0 : i32
    %11 = tpu.memref_slice %arg2[%10, %c0_i32_6] : memref<256x128xf32, #tpu.memory_space<any>> -> memref<1x128xf32, #tpu.memory_space<any>>
    %c2_i32_7 = arith.constant 2 : i32
    %c0_i32_8 = arith.constant 0 : i32
    %12 = tpu.memref_slice %arg4[%c2_i32_7, %c0_i32_8] : memref<8x128xf32, #tpu.memory_space<vmem>> -> memref<1x128xf32, #tpu.memory_space<vmem>>
    %13 = tpu.memref_slice %arg5[%c2_i32] : memref<8x!tpu.dma_semaphore, #tpu.memory_space<semaphore_mem>> -> memref<1x!tpu.dma_semaphore, #tpu.memory_space<semaphore_mem>>
    %14 = tpu.memref_squeeze %13 : memref<1x!tpu.dma_semaphore, #tpu.memory_space<semaphore_mem>> -> memref<!tpu.dma_semaphore, #tpu.memory_space<semaphore_mem>>
    tpu.enqueue_dma source(%11 : memref<1x128xf32, #tpu.memory_space<any>>) target(%12 : memref<1x128xf32, #tpu.memory_space<vmem>>) target_semaphore(%14 : memref<!tpu.dma_semaphore, #tpu.memory_space<semaphore_mem>>)
    %c3 = arith.constant 3 : index
    %15 = memref.load %arg1[%c3] : memref<8xi32, #tpu.memory_space<smem>>
    %c3_i32 = arith.constant 3 : i32
    %c0_i32_9 = arith.constant 0 : i32
    %16 = tpu.memref_slice %arg2[%15, %c0_i32_9] : memref<256x128xf32, #tpu.memory_space<any>> -> memref<1x128xf32, #tpu.memory_space<any>>
    %c3_i32_10 = arith.constant 3 : i32
    %c0_i32_11 = arith.constant 0 : i32
    %17 = tpu.memref_slice %arg4[%c3_i32_10, %c0_i32_11] : memref<8x128xf32, #tpu.memory_space<vmem>> -> memref<1x128xf32, #tpu.memory_space<vmem>>
    %18 = tpu.memref_slice %arg5[%c3_i32] : memref<8x!tpu.dma_semaphore, #tpu.memory_space<semaphore_mem>> -> memref<1x!tpu.dma_semaphore, #tpu.memory_space<semaphore_mem>>
    %19 = tpu.memref_squeeze %18 : memref<1x!tpu.dma_semaphore, #tpu.memory_space<semaphore_mem>> -> memref<!tpu.dma_semaphore, #tpu.memory_space<semaphore_mem>>
    tpu.enqueue_dma source(%16 : memref<1x128xf32, #tpu.memory_space<any>>) target(%17 : memref<1x128xf32, #tpu.memory_space<vmem>>) target_semaphore(%19 : memref<!tpu.dma_semaphore, #tpu.memory_space<semaphore_mem>>)
    %c4 = arith.constant 4 : index
    %20 = memref.load %arg1[%c4] : memref<8xi32, #tpu.memory_space<smem>>
    %c4_i32 = arith.constant 4 : i32
    %c0_i32_12 = arith.constant 0 : i32
    %21 = tpu.memref_slice %arg2[%20, %c0_i32_12] : memref<256x128xf32, #tpu.memory_space<any>> -> memref<1x128xf32, #tpu.memory_space<any>>
    %c4_i32_13 = arith.constant 4 : i32
    %c0_i32_14 = arith.constant 0 : i32
    %22 = tpu.memref_slice %arg4[%c4_i32_13, %c0_i32_14] : memref<8x128xf32, #tpu.memory_space<vmem>> -> memref<1x128xf32, #tpu.memory_space<vmem>>
    %23 = tpu.memref_slice %arg5[%c4_i32] : memref<8x!tpu.dma_semaphore, #tpu.memory_space<semaphore_mem>> -> memref<1x!tpu.dma_semaphore, #tpu.memory_space<semaphore_mem>>
    %24 = tpu.memref_squeeze %23 : memref<1x!tpu.dma_semaphore, #tpu.memory_space<semaphore_mem>> -> memref<!tpu.dma_semaphore, #tpu.memory_space<semaphore_mem>>
    tpu.enqueue_dma source(%21 : memref<1x128xf32, #tpu.memory_space<any>>) target(%22 : memref<1x128xf32, #tpu.memory_space<vmem>>) target_semaphore(%24 : memref<!tpu.dma_semaphore, #tpu.memory_space<semaphore_mem>>)
    %c5 = arith.constant 5 : index
    %25 = memref.load %arg1[%c5] : memref<8xi32, #tpu.memory_space<smem>>
    %c5_i32 = arith.constant 5 : i32
    %c0_i32_15 = arith.constant 0 : i32
    %26 = tpu.memref_slice %arg2[%25, %c0_i32_15] : memref<256x128xf32, #tpu.memory_space<any>> -> memref<1x128xf32, #tpu.memory_space<any>>
    %c5_i32_16 = arith.constant 5 : i32
    %c0_i32_17 = arith.constant 0 : i32
    %27 = tpu.memref_slice %arg4[%c5_i32_16, %c0_i32_17] : memref<8x128xf32, #tpu.memory_space<vmem>> -> memref<1x128xf32, #tpu.memory_space<vmem>>
    %28 = tpu.memref_slice %arg5[%c5_i32] : memref<8x!tpu.dma_semaphore, #tpu.memory_space<semaphore_mem>> -> memref<1x!tpu.dma_semaphore, #tpu.memory_space<semaphore_mem>>
    %29 = tpu.memref_squeeze %28 : memref<1x!tpu.dma_semaphore, #tpu.memory_space<semaphore_mem>> -> memref<!tpu.dma_semaphore, #tpu.memory_space<semaphore_mem>>
    tpu.enqueue_dma source(%26 : memref<1x128xf32, #tpu.memory_space<any>>) target(%27 : memref<1x128xf32, #tpu.memory_space<vmem>>) target_semaphore(%29 : memref<!tpu.dma_semaphore, #tpu.memory_space<semaphore_mem>>)
    %c6 = arith.constant 6 : index
    %30 = memref.load %arg1[%c6] : memref<8xi32, #tpu.memory_space<smem>>
    %c6_i32 = arith.constant 6 : i32
    %c0_i32_18 = arith.constant 0 : i32
    %31 = tpu.memref_slice %arg2[%30, %c0_i32_18] : memref<256x128xf32, #tpu.memory_space<any>> -> memref<1x128xf32, #tpu.memory_space<any>>
    %c6_i32_19 = arith.constant 6 : i32
    %c0_i32_20 = arith.constant 0 : i32
    %32 = tpu.memref_slice %arg4[%c6_i32_19, %c0_i32_20] : memref<8x128xf32, #tpu.memory_space<vmem>> -> memref<1x128xf32, #tpu.memory_space<vmem>>
    %33 = tpu.memref_slice %arg5[%c6_i32] : memref<8x!tpu.dma_semaphore, #tpu.memory_space<semaphore_mem>> -> memref<1x!tpu.dma_semaphore, #tpu.memory_space<semaphore_mem>>
    %34 = tpu.memref_squeeze %33 : memref<1x!tpu.dma_semaphore, #tpu.memory_space<semaphore_mem>> -> memref<!tpu.dma_semaphore, #tpu.memory_space<semaphore_mem>>
    tpu.enqueue_dma source(%31 : memref<1x128xf32, #tpu.memory_space<any>>) target(%32 : memref<1x128xf32, #tpu.memory_space<vmem>>) target_semaphore(%34 : memref<!tpu.dma_semaphore, #tpu.memory_space<semaphore_mem>>)
    %c7 = arith.constant 7 : index
    %35 = memref.load %arg1[%c7] : memref<8xi32, #tpu.memory_space<smem>>
    %c7_i32 = arith.constant 7 : i32
    %c0_i32_21 = arith.constant 0 : i32
    %36 = tpu.memref_slice %arg2[%35, %c0_i32_21] : memref<256x128xf32, #tpu.memory_space<any>> -> memref<1x128xf32, #tpu.memory_space<any>>
    %c7_i32_22 = arith.constant 7 : i32
    %c0_i32_23 = arith.constant 0 : i32
    %37 = tpu.memref_slice %arg4[%c7_i32_22, %c0_i32_23] : memref<8x128xf32, #tpu.memory_space<vmem>> -> memref<1x128xf32, #tpu.memory_space<vmem>>
    %38 = tpu.memref_slice %arg5[%c7_i32] : memref<8x!tpu.dma_semaphore, #tpu.memory_space<semaphore_mem>> -> memref<1x!tpu.dma_semaphore, #tpu.memory_space<semaphore_mem>>
    %39 = tpu.memref_squeeze %38 : memref<1x!tpu.dma_semaphore, #tpu.memory_space<semaphore_mem>> -> memref<!tpu.dma_semaphore, #tpu.memory_space<semaphore_mem>>
    tpu.enqueue_dma source(%36 : memref<1x128xf32, #tpu.memory_space<any>>) target(%37 : memref<1x128xf32, #tpu.memory_space<vmem>>) target_semaphore(%39 : memref<!tpu.dma_semaphore, #tpu.memory_space<semaphore_mem>>)
    %c0_i32_24 = arith.constant 0 : i32
    %c0_i32_25 = arith.constant 0 : i32
    %40 = tpu.memref_slice %arg2[%0, %c0_i32_25] : memref<256x128xf32, #tpu.memory_space<any>> -> memref<1x128xf32, #tpu.memory_space<any>>
    %c0_i32_26 = arith.constant 0 : i32
    %c0_i32_27 = arith.constant 0 : i32
    %41 = tpu.memref_slice %arg4[%c0_i32_26, %c0_i32_27] : memref<8x128xf32, #tpu.memory_space<vmem>> -> memref<1x128xf32, #tpu.memory_space<vmem>>
    %42 = tpu.memref_slice %arg5[%c0_i32_24] : memref<8x!tpu.dma_semaphore, #tpu.memory_space<semaphore_mem>> -> memref<1x!tpu.dma_semaphore, #tpu.memory_space<semaphore_mem>>
    %43 = tpu.memref_squeeze %42 : memref<1x!tpu.dma_semaphore, #tpu.memory_space<semaphore_mem>> -> memref<!tpu.dma_semaphore, #tpu.memory_space<semaphore_mem>>
    tpu.wait_dma2 semaphore(%43 : memref<!tpu.dma_semaphore, #tpu.memory_space<semaphore_mem>>) src(%40 : memref<1x128xf32, #tpu.memory_space<any>>) dst(%41 : memref<1x128xf32, #tpu.memory_space<vmem>>)
    %c1_i32_28 = arith.constant 1 : i32
    %c0_i32_29 = arith.constant 0 : i32
    %44 = tpu.memref_slice %arg2[%5, %c0_i32_29] : memref<256x128xf32, #tpu.memory_space<any>> -> memref<1x128xf32, #tpu.memory_space<any>>
    %c1_i32_30 = arith.constant 1 : i32
    %c0_i32_31 = arith.constant 0 : i32
    %45 = tpu.memref_slice %arg4[%c1_i32_30, %c0_i32_31] : memref<8x128xf32, #tpu.memory_space<vmem>> -> memref<1x128xf32, #tpu.memory_space<vmem>>
    %46 = tpu.memref_slice %arg5[%c1_i32_28] : memref<8x!tpu.dma_semaphore, #tpu.memory_space<semaphore_mem>> -> memref<1x!tpu.dma_semaphore, #tpu.memory_space<semaphore_mem>>
    %47 = tpu.memref_squeeze %46 : memref<1x!tpu.dma_semaphore, #tpu.memory_space<semaphore_mem>> -> memref<!tpu.dma_semaphore, #tpu.memory_space<semaphore_mem>>
    tpu.wait_dma2 semaphore(%47 : memref<!tpu.dma_semaphore, #tpu.memory_space<semaphore_mem>>) src(%44 : memref<1x128xf32, #tpu.memory_space<any>>) dst(%45 : memref<1x128xf32, #tpu.memory_space<vmem>>)
    %c2_i32_32 = arith.constant 2 : i32
    %c0_i32_33 = arith.constant 0 : i32
    %48 = tpu.memref_slice %arg2[%10, %c0_i32_33] : memref<256x128xf32, #tpu.memory_space<any>> -> memref<1x128xf32, #tpu.memory_space<any>>
    %c2_i32_34 = arith.constant 2 : i32
    %c0_i32_35 = arith.constant 0 : i32
    %49 = tpu.memref_slice %arg4[%c2_i32_34, %c0_i32_35] : memref<8x128xf32, #tpu.memory_space<vmem>> -> memref<1x128xf32, #tpu.memory_space<vmem>>
    %50 = tpu.memref_slice %arg5[%c2_i32_32] : memref<8x!tpu.dma_semaphore, #tpu.memory_space<semaphore_mem>> -> memref<1x!tpu.dma_semaphore, #tpu.memory_space<semaphore_mem>>
    %51 = tpu.memref_squeeze %50 : memref<1x!tpu.dma_semaphore, #tpu.memory_space<semaphore_mem>> -> memref<!tpu.dma_semaphore, #tpu.memory_space<semaphore_mem>>
    tpu.wait_dma2 semaphore(%51 : memref<!tpu.dma_semaphore, #tpu.memory_space<semaphore_mem>>) src(%48 : memref<1x128xf32, #tpu.memory_space<any>>) dst(%49 : memref<1x128xf32, #tpu.memory_space<vmem>>)
    %c3_i32_36 = arith.constant 3 : i32
    %c0_i32_37 = arith.constant 0 : i32
    %52 = tpu.memref_slice %arg2[%15, %c0_i32_37] : memref<256x128xf32, #tpu.memory_space<any>> -> memref<1x128xf32, #tpu.memory_space<any>>
    %c3_i32_38 = arith.constant 3 : i32
    %c0_i32_39 = arith.constant 0 : i32
    %53 = tpu.memref_slice %arg4[%c3_i32_38, %c0_i32_39] : memref<8x128xf32, #tpu.memory_space<vmem>> -> memref<1x128xf32, #tpu.memory_space<vmem>>
    %54 = tpu.memref_slice %arg5[%c3_i32_36] : memref<8x!tpu.dma_semaphore, #tpu.memory_space<semaphore_mem>> -> memref<1x!tpu.dma_semaphore, #tpu.memory_space<semaphore_mem>>
    %55 = tpu.memref_squeeze %54 : memref<1x!tpu.dma_semaphore, #tpu.memory_space<semaphore_mem>> -> memref<!tpu.dma_semaphore, #tpu.memory_space<semaphore_mem>>
    tpu.wait_dma2 semaphore(%55 : memref<!tpu.dma_semaphore, #tpu.memory_space<semaphore_mem>>) src(%52 : memref<1x128xf32, #tpu.memory_space<any>>) dst(%53 : memref<1x128xf32, #tpu.memory_space<vmem>>)
    %c4_i32_40 = arith.constant 4 : i32
    %c0_i32_41 = arith.constant 0 : i32
    %56 = tpu.memref_slice %arg2[%20, %c0_i32_41] : memref<256x128xf32, #tpu.memory_space<any>> -> memref<1x128xf32, #tpu.memory_space<any>>
    %c4_i32_42 = arith.constant 4 : i32
    %c0_i32_43 = arith.constant 0 : i32
    %57 = tpu.memref_slice %arg4[%c4_i32_42, %c0_i32_43] : memref<8x128xf32, #tpu.memory_space<vmem>> -> memref<1x128xf32, #tpu.memory_space<vmem>>
    %58 = tpu.memref_slice %arg5[%c4_i32_40] : memref<8x!tpu.dma_semaphore, #tpu.memory_space<semaphore_mem>> -> memref<1x!tpu.dma_semaphore, #tpu.memory_space<semaphore_mem>>
    %59 = tpu.memref_squeeze %58 : memref<1x!tpu.dma_semaphore, #tpu.memory_space<semaphore_mem>> -> memref<!tpu.dma_semaphore, #tpu.memory_space<semaphore_mem>>
    tpu.wait_dma2 semaphore(%59 : memref<!tpu.dma_semaphore, #tpu.memory_space<semaphore_mem>>) src(%56 : memref<1x128xf32, #tpu.memory_space<any>>) dst(%57 : memref<1x128xf32, #tpu.memory_space<vmem>>)
    %c5_i32_44 = arith.constant 5 : i32
    %c0_i32_45 = arith.constant 0 : i32
    %60 = tpu.memref_slice %arg2[%25, %c0_i32_45] : memref<256x128xf32, #tpu.memory_space<any>> -> memref<1x128xf32, #tpu.memory_space<any>>
    %c5_i32_46 = arith.constant 5 : i32
    %c0_i32_47 = arith.constant 0 : i32
    %61 = tpu.memref_slice %arg4[%c5_i32_46, %c0_i32_47] : memref<8x128xf32, #tpu.memory_space<vmem>> -> memref<1x128xf32, #tpu.memory_space<vmem>>
    %62 = tpu.memref_slice %arg5[%c5_i32_44] : memref<8x!tpu.dma_semaphore, #tpu.memory_space<semaphore_mem>> -> memref<1x!tpu.dma_semaphore, #tpu.memory_space<semaphore_mem>>
    %63 = tpu.memref_squeeze %62 : memref<1x!tpu.dma_semaphore, #tpu.memory_space<semaphore_mem>> -> memref<!tpu.dma_semaphore, #tpu.memory_space<semaphore_mem>>
    tpu.wait_dma2 semaphore(%63 : memref<!tpu.dma_semaphore, #tpu.memory_space<semaphore_mem>>) src(%60 : memref<1x128xf32, #tpu.memory_space<any>>) dst(%61 : memref<1x128xf32, #tpu.memory_space<vmem>>)
    %c6_i32_48 = arith.constant 6 : i32
    %c0_i32_49 = arith.constant 0 : i32
    %64 = tpu.memref_slice %arg2[%30, %c0_i32_49] : memref<256x128xf32, #tpu.memory_space<any>> -> memref<1x128xf32, #tpu.memory_space<any>>
    %c6_i32_50 = arith.constant 6 : i32
    %c0_i32_51 = arith.constant 0 : i32
    %65 = tpu.memref_slice %arg4[%c6_i32_50, %c0_i32_51] : memref<8x128xf32, #tpu.memory_space<vmem>> -> memref<1x128xf32, #tpu.memory_space<vmem>>
    %66 = tpu.memref_slice %arg5[%c6_i32_48] : memref<8x!tpu.dma_semaphore, #tpu.memory_space<semaphore_mem>> -> memref<1x!tpu.dma_semaphore, #tpu.memory_space<semaphore_mem>>
    %67 = tpu.memref_squeeze %66 : memref<1x!tpu.dma_semaphore, #tpu.memory_space<semaphore_mem>> -> memref<!tpu.dma_semaphore, #tpu.memory_space<semaphore_mem>>
    tpu.wait_dma2 semaphore(%67 : memref<!tpu.dma_semaphore, #tpu.memory_space<semaphore_mem>>) src(%64 : memref<1x128xf32, #tpu.memory_space<any>>) dst(%65 : memref<1x128xf32, #tpu.memory_space<vmem>>)
    %c7_i32_52 = arith.constant 7 : i32
    %c0_i32_53 = arith.constant 0 : i32
    %68 = tpu.memref_slice %arg2[%35, %c0_i32_53] : memref<256x128xf32, #tpu.memory_space<any>> -> memref<1x128xf32, #tpu.memory_space<any>>
    %c7_i32_54 = arith.constant 7 : i32
    %c0_i32_55 = arith.constant 0 : i32
    %69 = tpu.memref_slice %arg4[%c7_i32_54, %c0_i32_55] : memref<8x128xf32, #tpu.memory_space<vmem>> -> memref<1x128xf32, #tpu.memory_space<vmem>>
    %70 = tpu.memref_slice %arg5[%c7_i32_52] : memref<8x!tpu.dma_semaphore, #tpu.memory_space<semaphore_mem>> -> memref<1x!tpu.dma_semaphore, #tpu.memory_space<semaphore_mem>>
    %71 = tpu.memref_squeeze %70 : memref<1x!tpu.dma_semaphore, #tpu.memory_space<semaphore_mem>> -> memref<!tpu.dma_semaphore, #tpu.memory_space<semaphore_mem>>
    tpu.wait_dma2 semaphore(%71 : memref<!tpu.dma_semaphore, #tpu.memory_space<semaphore_mem>>) src(%68 : memref<1x128xf32, #tpu.memory_space<any>>) dst(%69 : memref<1x128xf32, #tpu.memory_space<vmem>>)
    %c0_56 = arith.constant 0 : index
    %c0_57 = arith.constant 0 : index
    %72 = vector.load %arg4[%c0_56, %c0_57] : memref<8x128xf32, #tpu.memory_space<vmem>>, vector<8x128xf32>
    %73 = arith.mulf %72, %72 : vector<8x128xf32>
    %cst = arith.constant dense<0.000000e+00> : vector<8xf32>
    %74 = vector.multi_reduction <add>, %73, %cst [1] : vector<8x128xf32> to vector<8xf32>
    %75 = vector.shape_cast %74 : vector<8xf32> to vector<8x1xf32>
    %76 = math.sqrt %75 : vector<8x1xf32>
    %cst_58 = arith.constant 1.000000e+00 : f32
    %77 = vector.broadcast %cst_58 : f32 to vector<8x1xf32>
    %78 = arith.cmpf ogt, %76, %77 : vector<8x1xf32>
    %cst_59 = arith.constant 1.000000e-07 : f32
    %79 = vector.broadcast %cst_59 : f32 to vector<8x1xf32>
    %80 = arith.addf %76, %79 : vector<8x1xf32>
    %cst_60 = arith.constant 1.000000e+00 : f32
    %81 = vector.broadcast %cst_60 : f32 to vector<8x1xf32>
    %82 = arith.divf %81, %80 : vector<8x1xf32>
    %cst_61 = arith.constant 1.000000e+00 : f32
    %83 = vector.broadcast %cst_61 : f32 to vector<8x1xf32>
    %84 = arith.select %78, %82, %83 : vector<8x1xi1>, vector<8x1xf32>
    %85 = vector.broadcast %84 : vector<8x1xf32> to vector<8x128xf32>
    %86 = arith.mulf %72, %85 : vector<8x128xf32>
    %c0_62 = arith.constant 0 : index
    %c0_63 = arith.constant 0 : index
    %87 = vector.load %arg3[%c0_62, %c0_63] : memref<8x128xf32, #tpu.memory_space<vmem>>, vector<8x128xf32>
    tpu.vector_store %arg3[%c0_62, %c0_63], %86 {strides = array<i32>} : memref<8x128xf32, #tpu.memory_space<vmem>>, vector<8x128xf32>,
    return
  }
  func.func @transform_1(%arg0: i32, %arg1: memref<8xi32, #tpu.memory_space<smem>>) -> (i32, i32) {
    %c0_i32 = arith.constant 0 : i32
    %c0_i32_0 = arith.constant 0 : i32
    %c0_i32_1 = arith.constant 0 : i32
    return %c0_i32, %c0_i32_0 : i32, i32
  }
}

</mosaic_0001>

<bundles_post_ra>
// kernel: tpu_custom_call.1
= control target key start
LH: loop header
LB: loop body
LE: loop exit
PB: predicated region body
PF: predicated region fallthrough
CT: control target
= control target key end

     0   :  { %s716_s0 = inlined_call_operand.hbm [shape: s32[8], index: 0, kind: input, shape index: {}]   ;;  %s717_s1 = inlined_call_operand.hbm [shape: f32[256,128], index: 1, kind: input, shape index: {}]   ;;  %s718_s2 = inlined_call_operand.hbm [shape: f32[8,128], index: 2, kind: output, shape index: {}]  }
   0x1   :  { %s295_s11 = scalar_lea.hbm %s716_s0, 16 }
   0x2   :  { %p296_p0 = scmp.ne.s32.totalorder %s716_s0, %s295_s11  ;;  %p299_p1 = scmp.lt.u32.totalorder %s295_s11, %s716_s0 }
   0x4   :  { %p301_p2 = pnand %p299_p1, %p296_p0 }
   0x6   :  { %304 = shalt.err (!%p301_p2)  }
   0x7   :  { %s539_s16 = smov [#allocation5]  }
   0x8   :  { %8 = dma.hbm_to_smem %s716_s0, 16, %s539_s16, [#allocation4] }
   0x9   :  { %519 = dma.done.wait [#allocation4], 16 }
   0xa   :  { %520 = vsyncadd [#allocation4], 4294967280 }
   0xb   :  { %10 = sfence }
   0xc   :  { %11 = vsyncpa [#allocation7], 0  ;;  %s12_s19 = sld [smem:[#allocation5]]  ;;  %s540_s20 = smov [#allocation2]  }
   0xd   :  { %s22_s21 = sshll.u32 %s540_s20, 4  ;;  %s576_s22 = sld [smem:[#allocation5 + $0x1]]  ;;  %s578_s21 = int_to_ptr.vmem [resolvable:$true] %s22_s21 }
   0xe   :  { %s541_s23 = smov [#allocation2 + $0x1]   ;;  %s580_s25 = sld [smem:[#allocation5 + $0x2]] }
   0xf   :  { %s38_s24 = sshll.u32 %s541_s23, 4  ;;  %s542_s26 = smov [#allocation2 + $0x2]   ;;  %s582_s24 = int_to_ptr.vmem [resolvable:$true] %s38_s24 }
  0x10   :  { %s54_s0 = sshll.u32 %s542_s26, 4  ;;  %s584_s27 = sld [smem:[#allocation5 + $0x3]]  ;;  %s586_s0 = int_to_ptr.vmem [resolvable:$true] %s54_s0 }
  0x11   :  { %s595_s8 = scalar_lea.hbm %s717_s1, 4096 }
  0x12   :  { %s258_s28 = sshll.u32 %s12_s19, 4 }
  0x13   :  { %s14_s3 = scalar_lea.hbm %s717_s1, %s258_s28  ;;  %s260_s4 = sshll.u32 %s576_s22, 4 }
  0x14   :  { %s305_s5 = scalar_lea.hbm %s14_s3, 16  ;;  %p308_p4 = scmp.lt.u32.totalorder %s14_s3, %s717_s1 }
  0x15   :  { %p306_p3 = scmp.ne.s32.totalorder %s14_s3, %s305_s5  ;;  %p309_p5 = scmp.lt.u32.totalorder %s595_s8, %s305_s5 }
  0x16   :  { %p311_p7 = scmp.lt.u32.totalorder %s305_s5, %s14_s3 }
  0x17   :  { %p310_p6 = por %p309_p5, %p308_p4 }
  0x19   :  { %p312_p8 = por %p311_p7, %p310_p6 }
  0x1b   :  { %p313_p9 = pnand %p312_p8, %p306_p3 }
  0x1d   :  { %316 = shalt.err (!%p313_p9)  }
  0x1e   :  { %s317_s11 = scalar_lea.vmem %s578_s21, 16  ;;  %s604_s12 = scalar_lea.vmem %s578_s21, 128 }
  0x1f   :  { %p318_p10 = scmp.ne.s32.totalorder %s578_s21, %s317_s11  ;;  %p322_p11 = scmp.lt.s32.totalorder %s578_s21, %s578_s21 }
  0x20   :  { %p323_p12 = scmp.lt.s32.totalorder %s604_s12, %s317_s11 }
  0x22   :  { %p324_p13 = por %p323_p12, %p322_p11 }
  0x24   :  { %p325_p0 = pnand %p324_p13, %p318_p10 }
  0x26   :  { %328 = shalt.err (!%p325_p0)  }
  0x27   :  { %25 = dma.hbm_to_vmem [thread:$0]  %s14_s3, 16, %s578_s21, [#allocation3] }
  0x28   :  { %s28_s15 = scalar_lea.hbm %s717_s1, %s260_s4  ;;  %s262_s16 = sshll.u32 %s580_s25, 4 }
  0x29   :  { %s329_s17 = scalar_lea.hbm %s28_s15, 16  ;;  %p332_p2 = scmp.lt.u32.totalorder %s28_s15, %s717_s1 }
  0x2a   :  { %p330_p1 = scmp.ne.s32.totalorder %s28_s15, %s329_s17  ;;  %p333_p3 = scmp.lt.u32.totalorder %s595_s8, %s329_s17 }
  0x2b   :  { %p335_p5 = scmp.lt.u32.totalorder %s329_s17, %s28_s15 }
  0x2c   :  { %p334_p4 = por %p333_p3, %p332_p2 }
  0x2e   :  { %p336_p6 = por %p335_p5, %p334_p4 }
  0x30   :  { %p337_p7 = pnand %p336_p6, %p330_p1 }
  0x32   :  { %340 = shalt.err (!%p337_p7)  }
  0x33   :  { %s341_s20 = scalar_lea.vmem %s582_s24, 16  ;;  %p346_p9 = scmp.lt.s32.totalorder %s582_s24, %s578_s21 }
  0x34   :  { %p342_p8 = scmp.ne.s32.totalorder %s582_s24, %s341_s20  ;;  %p347_p10 = scmp.lt.s32.totalorder %s604_s12, %s341_s20 }
  0x36   :  { %p348_p11 = por %p347_p10, %p346_p9 }
  0x38   :  { %p349_p12 = pnand %p348_p11, %p342_p8 }
  0x3a   :  { %352 = shalt.err (!%p349_p12)  }
  0x3b   :  { %41 = dma.hbm_to_vmem [thread:$0]  %s28_s15, 16, %s582_s24, [#allocation3 + $0x1] }
  0x3c   :  { %s44_s25 = scalar_lea.hbm %s717_s1, %s262_s16  ;;  %s264_s26 = sshll.u32 %s584_s27, 4 }
  0x3d   :  { %s353_s28 = scalar_lea.hbm %s44_s25, 16  ;;  %p356_p0 = scmp.lt.u32.totalorder %s44_s25, %s717_s1 }
  0x3e   :  { %p354_p13 = scmp.ne.s32.totalorder %s44_s25, %s353_s28  ;;  %p357_p1 = scmp.lt.u32.totalorder %s595_s8, %s353_s28 }
  0x3f   :  { %p359_p3 = scmp.lt.u32.totalorder %s353_s28, %s44_s25 }
  0x40   :  { %p358_p2 = por %p357_p1, %p356_p0 }
  0x42   :  { %p360_p4 = por %p359_p3, %p358_p2 }
  0x44   :  { %p361_p5 = pnand %p360_p4, %p354_p13 }
  0x46   :  { %364 = shalt.err (!%p361_p5)  }
  0x47   :  { %s365_s24 = scalar_lea.vmem %s586_s0, 16  ;;  %p370_p7 = scmp.lt.s32.totalorder %s586_s0, %s578_s21 }
  0x48   :  { %p366_p6 = scmp.ne.s32.totalorder %s586_s0, %s365_s24  ;;  %p371_p8 = scmp.lt.s32.totalorder %s604_s12, %s365_s24 }
  0x4a   :  { %p372_p9 = por %p371_p8, %p370_p7 }
  0x4c   :  { %p373_p10 = pnand %p372_p9, %p366_p6 }
  0x4e   :  { %376 = shalt.err (!%p373_p10)  }
  0x4f   :  { %57 = dma.hbm_to_vmem [thread:$0]  %s44_s25, 16, %s586_s0, [#allocation3 + $0x2] }
  0x50   :  { %s60_s4 = scalar_lea.hbm %s717_s1, %s264_s26  ;;  %s543_s5 = smov [#allocation2 + $0x3]  }
  0x51   :  { %s70_s6 = sshll.u32 %s543_s5, 4  ;;  %s641_s7 = sld [smem:[#allocation5 + $0x4]]  ;;  %s71_s6 = int_to_ptr.vmem [resolvable:$true] %s70_s6 }
  0x52   :  { %s377_s9 = scalar_lea.hbm %s60_s4, 16  ;;  %p380_p12 = scmp.lt.u32.totalorder %s60_s4, %s717_s1 }
  0x53   :  { %p378_p11 = scmp.ne.s32.totalorder %s60_s4, %s377_s9  ;;  %p381_p13 = scmp.lt.u32.totalorder %s595_s8, %s377_s9 }
  0x54   :  { %p383_p1 = scmp.lt.u32.totalorder %s377_s9, %s60_s4 }
  0x55   :  { %p382_p0 = por %p381_p13, %p380_p12 }
  0x57   :  { %p384_p2 = por %p383_p1, %p382_p0 }
  0x59   :  { %p385_p3 = pnand %p384_p2, %p378_p11 }
  0x5b   :  { %388 = shalt.err (!%p385_p3)  }
  0x5c   :  { %s389_s0 = scalar_lea.vmem %s71_s6, 16  ;;  %p394_p5 = scmp.lt.s32.totalorder %s71_s6, %s578_s21 }
  0x5d   :  { %p390_p4 = scmp.ne.s32.totalorder %s71_s6, %s389_s0  ;;  %p395_p6 = scmp.lt.s32.totalorder %s604_s12, %s389_s0 }
  0x5f   :  { %p396_p7 = por %p395_p6, %p394_p5 }
  0x61   :  { %p397_p8 = pnand %p396_p7, %p390_p4 }
  0x63   :  { %400 = shalt.err (!%p397_p8)  }
  0x64   :  { %73 = dma.hbm_to_vmem [thread:$0]  %s60_s4, 16, %s71_s6, [#allocation3 + $0x3] }
  0x65   :  { %s544_s13 = smov [#allocation2 + $0x4]   ;;  %s649_s15 = sld [smem:[#allocation5 + $0x5]] }
  0x66   :  { %s86_s14 = sshll.u32 %s544_s13, 4  ;;  %s545_s16 = smov [#allocation2 + $0x5]   ;;  %s87_s14 = int_to_ptr.vmem [resolvable:$true] %s86_s14 }
  0x67   :  { %s102_s17 = sshll.u32 %s545_s16, 4  ;;  %s651_s18 = sld [smem:[#allocation5 + $0x6]]  ;;  %s654_s17 = int_to_ptr.vmem [resolvable:$true] %s102_s17 }
  0x68   :  { %s266_s19 = sshll.u32 %s641_s7, 4 }
  0x69   :  { %s76_s23 = scalar_lea.hbm %s717_s1, %s266_s19 }
  0x6a   :  { %s401_s25 = scalar_lea.hbm %s76_s23, 16  ;;  %p404_p10 = scmp.lt.u32.totalorder %s76_s23, %s717_s1 }
  0x6b   :  { %p402_p9 = scmp.ne.s32.totalorder %s76_s23, %s401_s25  ;;  %p405_p11 = scmp.lt.u32.totalorder %s595_s8, %s401_s25 }
  0x6c   :  { %p407_p13 = scmp.lt.u32.totalorder %s401_s25, %s76_s23 }
  0x6d   :  { %p406_p12 = por %p405_p11, %p404_p10 }
  0x6f   :  { %p408_p0 = por %p407_p13, %p406_p12 }
  0x71   :  { %p409_p1 = pnand %p408_p0, %p402_p9 }
  0x73   :  { %412 = shalt.err (!%p409_p1)  }
  0x74   :  { %s413_s29 = scalar_lea.vmem %s87_s14, 16  ;;  %p418_p3 = scmp.lt.s32.totalorder %s87_s14, %s578_s21 }
  0x75   :  { %p414_p2 = scmp.ne.s32.totalorder %s87_s14, %s413_s29  ;;  %p419_p4 = scmp.lt.s32.totalorder %s604_s12, %s413_s29 }
  0x77   :  { %p420_p5 = por %p419_p4, %p418_p3 }
  0x79   :  { %p421_p6 = pnand %p420_p5, %p414_p2 }
  0x7b   :  { %424 = shalt.err (!%p421_p6)  }
  0x7c   :  { %89 = dma.hbm_to_vmem [thread:$0]  %s76_s23, 16, %s87_s14, [#allocation3 + $0x4] }
  0x7d   :  { %s268_s30 = sshll.u32 %s649_s15, 4  ;;  %s546_s24 = smov [#allocation2 + $0x6]  }
  0x7e   :  { %s118_s27 = sshll.u32 %s546_s24, 4  ;;  %s92_s5 = scalar_lea.hbm %s717_s1, %s268_s30  ;;  %s669_s27 = int_to_ptr.vmem [resolvable:$true] %s118_s27 }
  0x7f   :  { %s425_s6 = scalar_lea.hbm %s92_s5, 16  ;;  %p428_p8 = scmp.lt.u32.totalorder %s92_s5, %s717_s1 }
  0x80   :  { %p426_p7 = scmp.ne.s32.totalorder %s92_s5, %s425_s6  ;;  %p429_p9 = scmp.lt.u32.totalorder %s595_s8, %s425_s6 }
  0x81   :  { %p431_p11 = scmp.lt.u32.totalorder %s425_s6, %s92_s5 }
  0x82   :  { %p430_p10 = por %p429_p9, %p428_p8 }
  0x84   :  { %p432_p12 = por %p431_p11, %p430_p10 }
  0x86   :  { %p433_p13 = pnand %p432_p12, %p426_p7 }
  0x88   :  { %436 = shalt.err (!%p433_p13)  }
  0x89   :  { %s437_s10 = scalar_lea.vmem %s654_s17, 16  ;;  %p442_p1 = scmp.lt.s32.totalorder %s654_s17, %s578_s21 }
  0x8a   :  { %p438_p0 = scmp.ne.s32.totalorder %s654_s17, %s437_s10  ;;  %p443_p2 = scmp.lt.s32.totalorder %s604_s12, %s437_s10 }
  0x8c   :  { %p444_p3 = por %p443_p2, %p442_p1 }
  0x8e   :  { %p445_p4 = pnand %p444_p3, %p438_p0 }
  0x90   :  { %448 = shalt.err (!%p445_p4)  }
  0x91   :  { %105 = dma.hbm_to_vmem [thread:$0]  %s92_s5, 16, %s654_s17, [#allocation3 + $0x5] }
  0x92   :  { %s270_s11 = sshll.u32 %s651_s18, 4  ;;  %s271_s0 = sld [smem:[#allocation5 + $0x7]] }
  0x93   :  { %s108_s15 = scalar_lea.hbm %s717_s1, %s270_s11 }
  0x94   :  { %s449_s16 = scalar_lea.hbm %s108_s15, 16  ;;  %p452_p6 = scmp.lt.u32.totalorder %s108_s15, %s717_s1 }
  0x95   :  { %p450_p5 = scmp.ne.s32.totalorder %s108_s15, %s449_s16  ;;  %p453_p7 = scmp.lt.u32.totalorder %s595_s8, %s449_s16 }
  0x96   :  { %p455_p9 = scmp.lt.u32.totalorder %s449_s16, %s108_s15 }
  0x97   :  { %p454_p8 = por %p453_p7, %p452_p6 }
  0x99   :  { %p456_p10 = por %p455_p9, %p454_p8 }
  0x9b   :  { %p457_p11 = pnand %p456_p10, %p450_p5 }
  0x9d   :  { %460 = shalt.err (!%p457_p11)  }
  0x9e   :  { %s461_s17 = scalar_lea.vmem %s669_s27, 16  ;;  %p466_p13 = scmp.lt.s32.totalorder %s669_s27, %s578_s21 }
  0x9f   :  { %p462_p12 = scmp.ne.s32.totalorder %s669_s27, %s461_s17  ;;  %p467_p0 = scmp.lt.s32.totalorder %s604_s12, %s461_s17 }
  0xa1   :  { %p468_p1 = por %p467_p0, %p466_p13 }
  0xa3   :  { %p469_p2 = pnand %p468_p1, %p462_p12 }
  0xa5   :  { %472 = shalt.err (!%p469_p2)  }
  0xa6   :  { %121 = dma.hbm_to_vmem [thread:$0]  %s108_s15, 16, %s669_s27, [#allocation3 + $0x6] }
  0xa7   :  { %s547_s18 = smov [#allocation2 + $0x7]   ;;  %s272_s23 = sshll.u32 %s271_s0, 4 }
  0xa8   :  { %s134_s22 = sshll.u32 %s547_s18, 4  ;;  %s124_s28 = scalar_lea.hbm %s717_s1, %s272_s23  ;;  %s135_s22 = int_to_ptr.vmem [resolvable:$true] %s134_s22 }
  0xa9   :  { %s473_s29 = scalar_lea.hbm %s124_s28, 16  ;;  %p476_p4 = scmp.lt.u32.totalorder %s124_s28, %s717_s1 }
  0xaa   :  { %p474_p3 = scmp.ne.s32.totalorder %s124_s28, %s473_s29  ;;  %p477_p5 = scmp.lt.u32.totalorder %s595_s8, %s473_s29 }
  0xab   :  { %p479_p7 = scmp.lt.u32.totalorder %s473_s29, %s124_s28 }
  0xac   :  { %p478_p6 = por %p477_p5, %p476_p4 }
  0xae   :  { %p480_p8 = por %p479_p7, %p478_p6 }
  0xb0   :  { %p481_p9 = pnand %p480_p8, %p474_p3 }
  0xb2   :  { %484 = shalt.err (!%p481_p9)  }
  0xb3   :  { %s485_s27 = scalar_lea.vmem %s135_s22, 16  ;;  %p490_p11 = scmp.lt.s32.totalorder %s135_s22, %s578_s21 }
  0xb4   :  { %p486_p10 = scmp.ne.s32.totalorder %s135_s22, %s485_s27  ;;  %p491_p12 = scmp.lt.s32.totalorder %s604_s12, %s485_s27 }
  0xb6   :  { %p492_p13 = por %p491_p12, %p490_p11 }
  0xb8   :  { %p493_p0 = pnand %p492_p13, %p486_p10 }
  0xba   :  { %496 = shalt.err (!%p493_p0)  }
  0xbb   :  { %137 = dma.hbm_to_vmem [thread:$0]  %s124_s28, 16, %s135_s22, [#allocation3 + $0x7] }
  0xbc   :  { %521 = dma.done.wait [#allocation3], 16 }
  0xbd   :  { %522 = vsyncadd [#allocation3], 4294967280 }
  0xbe   :  { %523 = dma.done.wait [#allocation3 + $0x1], 16 }
  0xbf   :  { %524 = vsyncadd [#allocation3 + $0x1], 4294967280 }
  0xc0   :  { %525 = dma.done.wait [#allocation3 + $0x2], 16 }
  0xc1   :  { %526 = vsyncadd [#allocation3 + $0x2], 4294967280 }
  0xc2   :  { %527 = dma.done.wait [#allocation3 + $0x3], 16 }
  0xc3   :  { %528 = vsyncadd [#allocation3 + $0x3], 4294967280 }
  0xc4   :  { %529 = dma.done.wait [#allocation3 + $0x4], 16 }
  0xc5   :  { %530 = vsyncadd [#allocation3 + $0x4], 4294967280 }
  0xc6   :  { %531 = dma.done.wait [#allocation3 + $0x5], 16 }
  0xc7   :  { %532 = vsyncadd [#allocation3 + $0x5], 4294967280 }
  0xc8   :  { %533 = dma.done.wait [#allocation3 + $0x6], 16 }
  0xc9   :  { %534 = vsyncadd [#allocation3 + $0x6], 4294967280 }
  0xca   :  { %535 = dma.done.wait [#allocation3 + $0x7], 16 }
  0xcb   :  { %536 = vsyncadd [#allocation3 + $0x7], 4294967280  ;;  %v155_v0 = vld [vmem:[#allocation2] sm:$0xff]  ;;  %s548_s1 = smov [#allocation6]  }
  0xcc   :  { %v156_v1 = vmul.f32 %v155_v0, %v155_v0  ;;  %s179_s21 = sshll.u32 %s548_s1, 4  ;;  %s180_s21 = int_to_ptr.vmem [resolvable:$true] %s179_s21 }
  0xcd   :  { %s497_s8 = scalar_lea.vmem %s180_s21, 128  ;;  %p502_p2 = scmp.lt.s32.totalorder %s180_s21, %s180_s21 }
  0xce   :  { %157 = vadd.xlane.f32.xlu0 %v156_v1  ;;  %p498_p1 = scmp.ne.s32.totalorder %s180_s21, %s497_s8  ;;  %p503_p3 = scmp.lt.s32.totalorder %s497_s8, %s497_s8 }
  0xd0   :  { %p504_p4 = por %p503_p3, %p502_p2 }
  0xd2   :  { %p505_p5 = pnand %p504_p4, %p498_p1 }
 0x15b   :  { %v158_v2 = vpop.xlane.xlu0 %157 }
 0x15c   :  { %291 = vrsqrt.f32 %v158_v2  ;;  %vm161_vm0 = vcmp.eq.f32.partialorder %v158_v2, inf  ;;  %v164_v5 = vand.u32 2147483648, %v158_v2  ;;  %vm163_vm1 = vcmp.eq.f32.partialorder %v158_v2, 0.0 }
 0x166   :  { %v292_v3 = vpop.eup %291 }
 0x167   :  { %v160_v4 = vmul.f32 %v292_v3, %v158_v2 }
 0x169   :  { %v162_v6 = vsel %vm161_vm0, %v158_v2, %v160_v4 }
 0x16a   :  { %v165_v7 = vsel %vm163_vm1, %v164_v5, %v162_v6 }
 0x16b   :  { %v167_v8 = vadd.f32 1e-07, %v165_v7  ;;  %vm166_vm2 = vcmp.gt.f32.partialorder %v165_v7, 1.0 }
 0x16d   :  { %293 = vrcp.f32 %v167_v8 }
 0x177   :  { %v294_v9 = vpop.eup %293 }
 0x178   :  { %v170_v10 = vsel %vm166_vm2, %v294_v9, 1.0 }
 0x179   :  { %v171_v11 = vmul.f32 %v170_v10, %v155_v0 }
 0x17b   :  { %172 = vst [vmem:[#allocation6] sm:$0xff] %v171_v11 }
 0x17c   :  { %508 = shalt.err (!%p505_p5)
}
 0x17d   :  { %s509_s4 = scalar_lea.hbm %s718_s2, 128 }
 0x17e   :  { %p510_p6 = scmp.ne.s32.totalorder %s718_s2, %s509_s4  ;;  %p513_p7 = scmp.lt.u32.totalorder %s509_s4, %s718_s2 }
 0x180   :  { %p515_p8 = pnand %p513_p7, %p510_p6 }
 0x182   :  { %518 = shalt.err (!%p515_p8)
}
 0x183   :  { %182 = dma.vmem_to_hbm [thread:$0]  %s180_s21, 128, %s718_s2, [#allocation7]  }
 0x184   :  { %537 = dma.done.wait [#allocation7], 128  }
 0x185   :  { %538 = vsyncadd [#allocation7], 4294967168 }
 0x186   :  { %186 = vsyncpa [#allocation7], 1 }
 0x187   :  { %187 = vsyncmov [#allocation3] }
 0x18a   :  { %s188_s0 = vpop.sfrf %187 }
 0x18b   :  { %p273_p9 = scmp.ne.s32.totalorder %s188_s0, 0 }
 0x18d   :  { %192 = shalt.err (%p273_p9)  }
 0x18e   :  { %194 = vsyncmov [#allocation3 + $0x1] }
 0x191   :  { %s195_s13 = vpop.sfrf %194 }
 0x192   :  { %p274_p10 = scmp.ne.s32.totalorder %s195_s13, 0 }
 0x194   :  { %199 = shalt.err (%p274_p10)  }
 0x195   :  { %201 = vsyncmov [#allocation3 + $0x2] }
 0x198   :  { %s202_s14 = vpop.sfrf %201 }
 0x199   :  { %p275_p11 = scmp.ne.s32.totalorder %s202_s14, 0 }
 0x19b   :  { %206 = shalt.err (%p275_p11)  }
 0x19c   :  { %208 = vsyncmov [#allocation3 + $0x3] }
 0x19f   :  { %s209_s15 = vpop.sfrf %208 }
 0x1a0   :  { %p276_p12 = scmp.ne.s32.totalorder %s209_s15, 0 }
 0x1a2   :  { %213 = shalt.err (%p276_p12)  }
 0x1a3   :  { %215 = vsyncmov [#allocation3 + $0x4] }
 0x1a6   :  { %s216_s2 = vpop.sfrf %215 }
 0x1a7   :  { %p277_p13 = scmp.ne.s32.totalorder %s216_s2, 0 }
 0x1a9   :  { %220 = shalt.err (%p277_p13)  }
 0x1aa   :  { %222 = vsyncmov [#allocation3 + $0x5] }
 0x1ad   :  { %s223_s16 = vpop.sfrf %222 }
 0x1ae   :  { %p278_p0 = scmp.ne.s32.totalorder %s223_s16, 0 }
 0x1b0   :  { %227 = shalt.err (%p278_p0)  }
 0x1b1   :  { %229 = vsyncmov [#allocation3 + $0x6] }
 0x1b4   :  { %s230_s19 = vpop.sfrf %229 }
 0x1b5   :  { %p279_p1 = scmp.ne.s32.totalorder %s230_s19, 0 }
 0x1b7   :  { %234 = shalt.err (%p279_p1)  }
 0x1b8   :  { %236 = vsyncmov [#allocation3 + $0x7] }
 0x1bb   :  { %s237_s20 = vpop.sfrf %236 }
 0x1bc   :  { %p280_p2 = scmp.ne.s32.totalorder %s237_s20, 0 }
 0x1be   :  { %241 = shalt.err (%p280_p2)  }

</bundles_post_ra>
